<compile_context>
chip_gen: v5e
topology: v5e:2x2
jax: 0.10.0
libtpu: 0.0.40
codegen_flags: <defaults>
</compile_context>

<pallas_src>
import functools

import numpy as np
import jax
import jax.numpy as jnp
from jax.experimental import pallas as pl
from jax.experimental.pallas import tpu as pltpu


_GAUSS_TAPS = np.array([0.05, 0.25, 0.4, 0.25, 0.05], dtype=np.float64)


def _gauss_conv_matrix(n):
    """1-D 5-tap Gaussian convolution matrix with replicate padding, shape (n, n)."""
    m = np.zeros((n, n), dtype=np.float64)
    for i in range(n):
        for t, wgt in enumerate(_GAUSS_TAPS):
            j = min(max(i + t - 2, 0), n - 1)
            m[i, j] += wgt
    return m


@functools.lru_cache(maxsize=None)
def _packed_factors(h, w, r, g):
    """A' = kron(I_r, A) (r*h, r*h) and B' = kron(I_g, B) (g*w, g*w), cached on device."""
    gh = _gauss_conv_matrix(h)
    gw = _gauss_conv_matrix(w)
    eh = np.zeros((h,), dtype=np.float64)
    eh[::2] = 1.0
    ew = np.zeros((w,), dtype=np.float64)
    ew[::2] = 1.0
    a = 2.0 * gh @ np.diag(eh) @ gh          # left factor (rows / H axis)
    b = 2.0 * gw.T @ np.diag(ew) @ gw.T      # right factor (cols / W axis)
    a2 = np.kron(np.eye(r), a)
    b2 = np.kron(np.eye(g), b)
    return (jnp.asarray(a2, dtype=jnp.float32), jnp.asarray(b2, dtype=jnp.float32))


def _vmem_capacity_bytes():
    try:
        return int(pltpu.get_tpu_info().vmem_capacity_bytes)
    except Exception:
        return 64 * 1024 * 1024  # v7x worst case


def _vmem_need_bytes(hb, wb):
    img = hb * wb * 4
    # x,y double-buffered + A',B' (double-buffered, conservatively) + intermediates/slack.
    return 4 * img + 2 * (hb * hb + wb * wb) * 4 + 4 * img


def _pick_r(h, wb, m, budget):
    """Sublane packing factor: target ~256 sublanes, bounded by remaining images and VMEM."""
    r = max(1, min(256 // h if h < 256 else 1, m))
    while r > 1 and _vmem_need_bytes(r * h, wb) > budget:
        r -= 1
    return r


def _edge_loss_kernel(x_ref, y_ref, a_ref, b_ref, o_ref, *, eps2):
    """x_ref/y_ref: (1, Hb, Wb); a_ref: (Hb, Hb); b_ref: (Wb, Wb); o_ref: (1, 1) SMEM slot."""
    # Cast each operand to f32 BEFORE subtracting (bf16/fp16 input safety).
    d = x_ref[0].astype(jnp.float32) - y_ref[0].astype(jnp.float32)      # (Hb, Wb)
    # conv_gauss -> masked 2x down/up -> conv_gauss collapses into two 2-D MXU matmuls.
    t = jnp.dot(d, b_ref[...], preferred_element_type=jnp.float32)       # (Hb, Wb)
    f = jnp.dot(a_ref[...], t, preferred_element_type=jnp.float32)       # (Hb, Wb)
    diff = d - f                                                         # = lap(x) - lap(y)
    # Per-step partial Charbonnier sum into this step's own output slot (parallel-safe).
    o_ref[0, 0] = jnp.sum(jnp.sqrt(diff * diff + jnp.float32(eps2)))


def edge_loss(x, y, eps=1e-3):
    """x, y: (N, C, H, W) float arrays. Returns the scalar EdgeLoss (forward only)."""
    assert x.shape == y.shape and x.ndim == 4
    n, c, h, w = x.shape
    nc = n * c
    # NOTE: grayscale inputs are repeated to 3 identical channels in the reference; the
    # per-channel results are identical so the mean is unchanged -> skip the repeat.

    # Lane / sublane packing factors.
    g = max(1, 128 // w) if w < 128 else 1           # images packed along lanes
    wb = g * w
    m = -(-nc // g)                                  # packed lane-groups needed
    cap = _vmem_capacity_bytes()
    budget = int(cap * 0.45)
    r = _pick_r(h, wb, m, budget)                    # lane-groups packed along sublanes
    hb = r * h
    steps = -(-m // r)
    imgs_per_step = r * g
    nc_pad = steps * imgs_per_step
    pad = nc_pad - nc

    a2, b2 = _packed_factors(h, w, r, g)

    eps2 = float(eps) * float(eps)
    xf = jnp.reshape(x, (nc, h, w))
    yf = jnp.reshape(y, (nc, h, w))
    if pad:
        xf = jnp.concatenate([xf, jnp.zeros((pad, h, w), xf.dtype)], axis=0)
        yf = jnp.concatenate([yf, jnp.zeros((pad, h, w), yf.dtype)], axis=0)
    if imgs_per_step > 1:
        # (steps*r*g, h, w) -> (steps, r*h, g*w): r images stacked on sublanes, g on lanes.
        xf = xf.reshape(steps, r, g, h, w).transpose(0, 1, 3, 2, 4).reshape(steps, hb, wb)
        yf = yf.reshape(steps, r, g, h, w).transpose(0, 1, 3, 2, 4).reshape(steps, hb, wb)
    else:
        xf = xf.reshape(steps, hb, wb)
        yf = yf.reshape(steps, hb, wb)

    vmem_limit = int(min(max(_vmem_need_bytes(hb, wb) * 5 // 4, 32 * 1024 * 1024),
                         int(cap * 0.9)))

    kernel = functools.partial(_edge_loss_kernel, eps2=eps2)
    partials = pl.pallas_call(
        kernel,
        out_shape=jax.ShapeDtypeStruct((steps, 1), jnp.float32),
        grid_spec=pltpu.PrefetchScalarGridSpec(
            num_scalar_prefetch=0,
            grid=(steps,),
            in_specs=[
                pl.BlockSpec((1, hb, wb), lambda i: (i, 0, 0)),
                pl.BlockSpec((1, hb, wb), lambda i: (i, 0, 0)),
                pl.BlockSpec((hb, hb), lambda i: (0, 0)),
                pl.BlockSpec((wb, wb), lambda i: (0, 0)),
            ],
            out_specs=pl.BlockSpec((1, 1), lambda i: (i, 0), memory_space=pltpu.SMEM),
        ),
        compiler_params=pltpu.CompilerParams(
            dimension_semantics=("parallel",),   # independent per-step partial sums
            vmem_limit_bytes=vmem_limit,
        ),
    )(xf, yf, a2, b2)

    total = jnp.sum(partials)
    if pad:
        # Zero-padded images contribute exactly sqrt(0 + eps^2) per element; subtract it.
        pad_term = jnp.sqrt(jnp.float32(eps2))
        total = total - jnp.float32(pad * h * w) * pad_term
    return total / jnp.float32(nc * h * w)


def _reference_edge_loss(x, y, eps=1e-3):
    """Pure-JAX translation of the PyTorch module, for correctness checking only."""
    k = jnp.asarray(_GAUSS_TAPS, dtype=jnp.float32)
    kk = jnp.outer(k, k)

    def conv_gauss(img):
        _, ch, _, _ = img.shape
        p = jnp.pad(img, ((0, 0), (0, 0), (2, 2), (2, 2)), mode="edge")
        wgt = jnp.broadcast_to(kk[None, None], (ch, 1, 5, 5))
        return jax.lax.conv_general_dilated(
            p, wgt, window_strides=(1, 1), padding="VALID",
            feature_group_count=ch,
            dimension_numbers=("NCHW", "OIHW", "NCHW"),
            precision=jax.lax.Precision.HIGHEST)

    def lap(cur):
        f = conv_gauss(cur)
        nf = jnp.zeros_like(f)
        nf = nf.at[:, :, ::2, ::2].set(f[:, :, ::2, ::2] * 4.0)
        return cur - conv_gauss(nf)

    d = lap(x) - lap(y)
    return jnp.mean(jnp.sqrt(d * d + jnp.float32(eps * eps)))


if __name__ == "__main__":
    key = jax.random.PRNGKey(0)
    N, C, H, W = 2, 3, 16, 16
    k1, k2 = jax.random.split(key)
    x = jax.random.uniform(k1, (N, C, H, W), dtype=jnp.float32)
    y = jax.random.uniform(k2, (N, C, H, W), dtype=jnp.float32)

    loss = edge_loss(x, y)
    jax.block_until_ready(loss)

    ref = _reference_edge_loss(x, y)
    np.testing.assert_allclose(np.asarray(loss), np.asarray(ref), rtol=2e-3, atol=1e-5)
    print("KERNEL_OK")
</pallas_src>

<mosaic_0001>
module attributes {stable_mosaic.version = 11 : i64} {
  func.func @_edge_loss_kernel(%arg0: i32, %arg1: memref<1x16x128xf32, #tpu.memory_space<vmem>>, %arg2: memref<1x16x128xf32, #tpu.memory_space<vmem>>, %arg3: memref<16x16xf32, #tpu.memory_space<vmem>>, %arg4: memref<128x128xf32, #tpu.memory_space<vmem>>, %arg5: memref<1x1xf32, #tpu.memory_space<smem>>) attributes {dimension_semantics = [#tpu.dimension_semantics<parallel>], iteration_bounds = array<i64: 1>, scalar_prefetch = 0 : i64, scratch_operands = 0 : i64, tpu.core_type = #tpu.core_type<tc>, window_params = [{transform_indices = @transform_0, window_bounds = array<i64: 1, 16, 128>}, {transform_indices = @transform_1, window_bounds = array<i64: 1, 16, 128>}, {pipeline_mode = #tpu.pipeline_mode<synchronous>, transform_indices = @transform_2, window_bounds = array<i64: 16, 16>}, {pipeline_mode = #tpu.pipeline_mode<synchronous>, transform_indices = @transform_3, window_bounds = array<i64: 128, 128>}, {transform_indices = @transform_4, window_bounds = array<i64: 1, 1>}]} {
    %c0 = arith.constant 0 : index
    %c0_0 = arith.constant 0 : index
    %c0_1 = arith.constant 0 : index
    %0 = vector.load %arg1[%c0, %c0_0, %c0_1] : memref<1x16x128xf32, #tpu.memory_space<vmem>>, vector<1x16x128xf32>
    %1 = vector.shape_cast %0 : vector<1x16x128xf32> to vector<16x128xf32>
    %c0_2 = arith.constant 0 : index
    %c0_3 = arith.constant 0 : index
    %c0_4 = arith.constant 0 : index
    %2 = vector.load %arg2[%c0_2, %c0_3, %c0_4] : memref<1x16x128xf32, #tpu.memory_space<vmem>>, vector<1x16x128xf32>
    %3 = vector.shape_cast %2 : vector<1x16x128xf32> to vector<16x128xf32>
    %4 = arith.subf %1, %3 : vector<16x128xf32>
    %c0_5 = arith.constant 0 : index
    %c0_6 = arith.constant 0 : index
    %5 = vector.load %arg4[%c0_5, %c0_6] : memref<128x128xf32, #tpu.memory_space<vmem>>, vector<128x128xf32>
    %cst = arith.constant dense<0.000000e+00> : vector<16x128xf32>
    %6 = tpu.matmul %4, %5, %cst {dimension_numbers = #tpu.dot_dimension_numbers<[1], [0], [0], [1], [0, 0, 1, 1], [], []>} : vector<16x128xf32>, vector<128x128xf32>, vector<16x128xf32> -> vector<16x128xf32>
    %c0_7 = arith.constant 0 : index
    %c0_8 = arith.constant 0 : index
    %7 = vector.load %arg3[%c0_7, %c0_8] : memref<16x16xf32, #tpu.memory_space<vmem>>, vector<16x16xf32>
    %cst_9 = arith.constant dense<0.000000e+00> : vector<16x128xf32>
    %8 = tpu.matmul %7, %6, %cst_9 {dimension_numbers = #tpu.dot_dimension_numbers<[1], [0], [0], [1], [0, 0, 1, 1], [], []>} : vector<16x16xf32>, vector<16x128xf32>, vector<16x128xf32> -> vector<16x128xf32>
    %9 = arith.subf %4, %8 : vector<16x128xf32>
    %10 = arith.mulf %9, %9 : vector<16x128xf32>
    %cst_10 = arith.constant 9.99999997E-7 : f32
    %11 = vector.broadcast %cst_10 : f32 to vector<16x128xf32>
    %12 = arith.addf %10, %11 : vector<16x128xf32>
    %13 = math.sqrt %12 : vector<16x128xf32>
    %14 = vector.shape_cast %13 : vector<16x128xf32> to vector<1x16x128xf32>
    %cst_11 = arith.constant dense<0.000000e+00> : vector<1xf32>
    %15 = vector.multi_reduction <add>, %14, %cst_11 [1, 2] : vector<1x16x128xf32> to vector<1xf32>
    %16 = vector.shape_cast %15 : vector<1xf32> to vector<1x1x1xf32>
    %17 = vector.extract %16[0, 0, 0] : f32 from vector<1x1x1xf32>
    %c0_12 = arith.constant 0 : index
    %c0_13 = arith.constant 0 : index
    %18 = memref.load %arg5[%c0_12, %c0_13] : memref<1x1xf32, #tpu.memory_space<smem>>
    memref.store %17, %arg5[%c0_12, %c0_13] : memref<1x1xf32, #tpu.memory_space<smem>>
    return
  }
  func.func @transform_0(%arg0: i32) -> (i32, i32, i32) {
    %c0_i32 = arith.constant 0 : i32
    %c0_i32_0 = arith.constant 0 : i32
    %c0_i32_1 = arith.constant 0 : i32
    return %arg0, %c0_i32, %c0_i32_0 : i32, i32, i32
  }
  func.func @transform_1(%arg0: i32) -> (i32, i32, i32) {
    %c0_i32 = arith.constant 0 : i32
    %c0_i32_0 = arith.constant 0 : i32
    %c0_i32_1 = arith.constant 0 : i32
    return %arg0, %c0_i32, %c0_i32_0 : i32, i32, i32
  }
  func.func @transform_2(%arg0: i32) -> (i32, i32) {
    %c0_i32 = arith.constant 0 : i32
    %c0_i32_0 = arith.constant 0 : i32
    %c0_i32_1 = arith.constant 0 : i32
    return %c0_i32, %c0_i32_0 : i32, i32
  }
  func.func @transform_3(%arg0: i32) -> (i32, i32) {
    %c0_i32 = arith.constant 0 : i32
    %c0_i32_0 = arith.constant 0 : i32
    %c0_i32_1 = arith.constant 0 : i32
    return %c0_i32, %c0_i32_0 : i32, i32
  }
  func.func @transform_4(%arg0: i32) -> (i32, i32) {
    %c0_i32 = arith.constant 0 : i32
    %c0_i32_0 = arith.constant 0 : i32
    return %arg0, %c0_i32 : i32, i32
  }
}

</mosaic_0001>

<bundles_post_ra>
// kernel: tpu_custom_call.1
= control target key start
LH: loop header
LB: loop body
LE: loop exit
PB: predicated region body
PF: predicated region fallthrough
CT: control target
= control target key end

     0   :  { %9 = vsyncpa [#allocation3], 0  ;;  %s412_s0 = inlined_call_operand.hbm [shape: f32[1,16,128], index: 0, kind: input, shape index: {}]   ;;  %s413_s1 = inlined_call_operand.hbm [shape: f32[1,16,128], index: 1, kind: input, shape index: {}]   ;;  %s414_s2 = inlined_call_operand.hbm [shape: f32[16,16], index: 2, kind: input, shape index: {}]   ;;  %s415_s3 = inlined_call_operand.hbm [shape: f32[128,128], index: 3, kind: input, shape index: {}]   ;;  %s416_s4 = inlined_call_operand.hbm [shape: f32[1,1], index: 4, kind: output, shape index: {}]  }
   0x1   :  { %10 = vsyncpa [#allocation6], 0 }
   0x2   :  { %11 = vsyncpa [#allocation9], 0 }
   0x3   :  { %12 = vsyncpa [#allocation4], 0  ;;  %s30_s17 = sshll.u32 %s413_s1, 4  ;;  %s365_s18 = smov [#allocation5]   ;;  %s31_s17 = int_to_ptr.hbm [resolvable:$true] %s30_s17 }
   0x4   :  { %s32_s19 = sshll.u32 %s365_s18, 4  ;;  %s17_s22 = sshll.u32 %s412_s0, 4  ;;  %s33_s19 = int_to_ptr.vmem [resolvable:$true] %s32_s19  ;;  %s18_s22 = int_to_ptr.hbm [resolvable:$true] %s17_s22 }
   0x5   :  { %s366_s23 = smov 128   ;;  %s367_s24 = smov 8  }
   0x6   :  { %38 = dma.hbm_to_vmem [thread:$0]  %s31_s17, 256, %s33_s19, [#allocation6], %s366_s23, %s366_s23, %s367_s24  }
   0x7   :  { %s368_s25 = smov [#allocation2]   ;;  %s43_s29 = sshll.u32 %s414_s2, 4  ;;  %s44_s29 = int_to_ptr.hbm [resolvable:$true] %s43_s29 }
   0x8   :  { %s19_s26 = sshll.u32 %s368_s25, 4  ;;  %s56_s5 = sshll.u32 %s415_s3, 4  ;;  %s20_s26 = int_to_ptr.vmem [resolvable:$true] %s19_s26  ;;  %s57_s5 = int_to_ptr.hbm [resolvable:$true] %s56_s5 }
   0x9   :  { %25 = dma.hbm_to_vmem [thread:$0]  %s18_s22, 256, %s20_s26, [#allocation3], %s366_s23, %s366_s23, %s367_s24  }
   0xa   :  { %s369_s6 = smov [#allocation7]   ;;  %s370_s0 = smov [#allocation8]  }
   0xb   :  { %s45_s7 = sshll.u32 %s369_s6, 4  ;;  %s58_s8 = sshll.u32 %s370_s0, 4  ;;  %s46_s7 = int_to_ptr.vmem [resolvable:$true] %s45_s7  ;;  %s59_s8 = int_to_ptr.vmem [resolvable:$true] %s58_s8 }
   0xc   :  { %51 = dma.hbm_to_vmem [thread:$0]  %s44_s29, 256, %s46_s7, [#allocation6], %s366_s23, %s366_s23, %s367_s24  }
   0xd   :  { %64 = dma.hbm_to_vmem [thread:$0]  %s57_s5, 2048, %s59_s8, [#allocation9], %s366_s23, %s366_s23, %s367_s24  }
   0xe   :  { %357 = dma.done.wait [#allocation3], 256  }
   0xf   :  { %358 = vsyncadd [#allocation3], 4294967040 }
  0x10   :  { %359 = dma.done.wait [#allocation6], 512  }
  0x11   :  { %360 = vsyncadd [#allocation6], 4294966784 }
  0x12   :  { %361 = dma.done.wait [#allocation9], 2048  }
  0x13   :  { %362 = vsyncadd [#allocation9], 4294965248  ;;  %v102_v0 = vld [vmem:[#allocation8 + $0x78] sm:$0xff]  ;;  %v101_v1 = vld [vmem:[#allocation8 + $0x70] sm:$0xff]  ;;  %vm128_vm0 = vcmask 130048   ;;  %s205_s9 = sshll.u32 %s416_s4, 4  ;;  %s206_s9 = int_to_ptr.hbm [resolvable:$true] %s205_s9 }
  0x14   :  { %220 = vmatpush.msra.mxu2 %v102_v0  ;;  %103 = vmatpush.msra.mxu0 %v102_v0  ;;  %v100_v2 = vld [vmem:[#allocation8 + $0x68] sm:$0xff]  ;;  %v99_v3 = vld [vmem:[#allocation8 + $0x60] sm:$0xff]  ;;  %v98_v4 = vld [vmem:[#allocation8 + $0x58] sm:$0xff]  ;;  %s371_s11 = smov [#allocation10]  }
  0x15   :  { %v97_v5 = vld [vmem:[#allocation8 + $0x50] sm:$0xff]  ;;  %v96_v6 = vld [vmem:[#allocation8 + $0x48] sm:$0xff]  ;;  %v95_v7 = vld [vmem:[#allocation8 + $0x40] sm:$0xff] }
  0x16   :  { %221 = vmatpush.msra.mxu2 %v101_v1  ;;  %104 = vmatpush.msra.mxu0 %v101_v1  ;;  %v94_v8 = vld [vmem:[#allocation8 + $0x38] sm:$0xff]  ;;  %v93_v9 = vld [vmem:[#allocation8 + $0x30] sm:$0xff]  ;;  %v92_v10 = vld [vmem:[#allocation8 + $0x28] sm:$0xff] }
  0x17   :  { %v91_v11 = vld [vmem:[#allocation8 + $0x20] sm:$0xff]  ;;  %v90_v12 = vld [vmem:[#allocation8 + $0x18] sm:$0xff]  ;;  %v89_v13 = vld [vmem:[#allocation8 + $0x10] sm:$0xff] }
  0x18   :  { %222 = vmatpush.msra.mxu2 %v100_v2  ;;  %105 = vmatpush.msra.mxu0 %v100_v2  ;;  %v82_v14 = vld [vmem:[#allocation2 + $0x8] sm:$0xff]  ;;  %v84_v15 = vld [vmem:[#allocation5 + $0x8] sm:$0xff]  ;;  %v81_v16 = vld [vmem:[#allocation2] sm:$0xff] }
  0x19   :  { %v83_v17 = vld [vmem:[#allocation5] sm:$0xff]  ;;  %v88_v18 = vld [vmem:[#allocation8 + $0x8] sm:$0xff]  ;;  %v86_v20 = vsub.f32 %v82_v14, %v84_v15  ;;  %v126_v24 = vld [vmem:[#allocation7] sm:$0xff] }
  0x1a   :  { %223 = vmatpush.msra.mxu2 %v99_v3  ;;  %106 = vmatpush.msra.mxu0 %v99_v3  ;;  %v87_v19 = vld [vmem:[#allocation8] sm:$0xff]  ;;  %v85_v21 = vsub.f32 %v81_v16, %v83_v17  ;;  %v127_v25 = vld [vmem:[#allocation7 + $0x8] sm:$0xff] }
  0x1c   :  { %224 = vmatpush.msra.mxu2 %v98_v4  ;;  %107 = vmatpush.msra.mxu0 %v98_v4 }
  0x1e   :  { %225 = vmatpush.msra.mxu2 %v97_v5  ;;  %108 = vmatpush.msra.mxu0 %v97_v5 }
  0x20   :  { %226 = vmatpush.msra.mxu2 %v96_v6  ;;  %109 = vmatpush.msra.mxu0 %v96_v6 }
  0x22   :  { %227 = vmatpush.msra.mxu2 %v95_v7  ;;  %110 = vmatpush.msra.mxu0 %v95_v7 }
  0x24   :  { %228 = vmatpush.msra.mxu2 %v94_v8  ;;  %111 = vmatpush.msra.mxu0 %v94_v8 }
  0x26   :  { %229 = vmatpush.msra.mxu2 %v93_v9  ;;  %112 = vmatpush.msra.mxu0 %v93_v9 }
  0x28   :  { %230 = vmatpush.msra.mxu2 %v92_v10  ;;  %113 = vmatpush.msra.mxu0 %v92_v10 }
  0x2a   :  { %231 = vmatpush.msra.mxu2 %v91_v11  ;;  %114 = vmatpush.msra.mxu0 %v91_v11 }
  0x2c   :  { %232 = vmatpush.msra.mxu2 %v90_v12  ;;  %115 = vmatpush.msra.mxu0 %v90_v12 }
  0x2e   :  { %233 = vmatpush.msra.mxu2 %v89_v13  ;;  %116 = vmatpush.msra.mxu0 %v89_v13 }
  0x30   :  { %234 = vmatpush.msra.mxu2 %v88_v18  ;;  %117 = vmatpush.msra.mxu0 %v88_v18 }
  0x32   :  { %235 = vmatpush.msra.mxu2 %v87_v19  ;;  %118 = vmatpush.msra.mxu0 %v87_v19 }
  0x33   :  { %122 = vmatmul.f32.vlgmr.msra.gmra.mxu2 %v86_v20  ;;  %119 = vmatmul.f32.vlgmr.msra.gmra.mxu0 %v85_v21 }
  0xb0   :  { %v120_v23 = vpop.f32.mrf.mxu0 }
  0xb6   :  { %v123_v22 = vpop.f32.mrf.mxu2 }
  0xb7   :  { %149 = vmatpush.msra.mxu1 %v123_v22 }
  0xb9   :  { %150 = vmatpush.msra.mxu1 %v120_v23 }
  0xba   :  { %218 = vmatmul.msk.f32.vlgmr.msra.gmra.mxu1 %vm128_vm0, %v126_v24 }
  0xc2   :  { %219 = vmatmul.msk.f32.gmra.mxu1 %vm128_vm0, %v127_v25 }
 0x137   :  { %v152_v26 = vpop.f32.mrf.mxu1 }
 0x138   :  { %v158_v27 = vsub.f32 %v85_v21, %v152_v26 }
 0x13a   :  { %v160_v28 = vmul.f32 %v158_v27, %v158_v27 }
 0x13c   :  { %v162_v29 = vadd.f32 1e-06, %v160_v28 }
 0x13e   :  { %245 = vrsqrt.f32 %v162_v29  ;;  %vm171_vm1 = vcmp.eq.f32.partialorder %v162_v29, inf  ;;  %v174_v49 = vand.u32 2147483648, %v162_v29  ;;  %vm173_vm3 = vcmp.eq.f32.partialorder %v162_v29, 0.0 }
 0x13f   :  { %v155_v30 = vpop.f32.mrf.mxu1 }
 0x140   :  { %v159_v31 = vsub.f32 %v86_v20, %v155_v30 }
 0x142   :  { %v161_v32 = vmul.f32 %v159_v31, %v159_v31 }
 0x144   :  { %v246_v33 = vpop.eup %245  ;;  %v163_v34 = vadd.f32 1e-06, %v161_v32 }
 0x145   :  { %v165_v35 = vmul.f32 %v246_v33, %v162_v29 }
 0x146   :  { %247 = vrsqrt.f32 %v163_v34  ;;  %vm183_vm2 = vcmp.eq.f32.partialorder %v163_v34, inf  ;;  %v186_v50 = vand.u32 2147483648, %v163_v34  ;;  %vm185_vm4 = vcmp.eq.f32.partialorder %v163_v34, 0.0 }
 0x147   :  { %v166_v36 = vmul.f32 %v246_v33, %v165_v35 }
 0x149   :  { %v167_v37 = vmul.f32 0.5, %v166_v36 }
 0x14b   :  { %v168_v38 = vsub.f32 1.5, %v167_v37 }
 0x14c   :  { %v248_v39 = vpop.eup %247 }
 0x14d   :  { %v177_v40 = vmul.f32 %v248_v39, %v163_v34  ;;  %v169_v41 = vmul.f32 %v246_v33, %v168_v38 }
 0x14f   :  { %v178_v42 = vmul.f32 %v248_v39, %v177_v40  ;;  %v170_v44 = vmul.f32 %v169_v41, %v162_v29 }
 0x151   :  { %v179_v43 = vmul.f32 0.5, %v178_v42  ;;  %v172_v47 = vsel %vm171_vm1, %v162_v29, %v170_v44 }
 0x152   :  { %v175_v52 = vsel %vm173_vm3, %v174_v49, %v172_v47 }
 0x153   :  { %v180_v45 = vsub.f32 1.5, %v179_v43 }
 0x155   :  { %v181_v46 = vmul.f32 %v248_v39, %v180_v45 }
 0x157   :  { %v182_v48 = vmul.f32 %v181_v46, %v163_v34 }
 0x159   :  { %v184_v51 = vsel %vm183_vm2, %v163_v34, %v182_v48 }
 0x15a   :  { %v187_v53 = vsel %vm185_vm4, %v186_v50, %v184_v51 }
 0x15b   :  { %v188_v54 = vadd.f32 %v187_v53, %v175_v52 }
 0x15d   :  { %189 = vadd.xlane.f32.xlu0 %v188_v54 }
 0x1d0   :  { %v190_v55 = vpop.xlane.xlu0 %189 }
 0x1d1   :  { %v191_v56 = vrot.slane %v190_v55, 4 }
 0x1d3   :  { %v192_v57 = vadd.f32 %v191_v56, %v190_v55 }
 0x1d5   :  { %v193_v58 = vrot.slane %v192_v57, 2 }
 0x1d7   :  { %v194_v59 = vadd.f32 %v193_v58, %v192_v57 }
 0x1d9   :  { %v195_v60 = vrot.slane %v194_v59, 1 }
 0x1db   :  { %v196_v61 = vadd.f32 %v195_v60, %v194_v59 }
 0x1dd   :  { %236 = vpush %v196_v61 }
 0x20e   :  { %s237_s10 = spop %236 }
 0x20f   :  { %199 = sst [smem:[#allocation10]] %s237_s10 }
 0x210   :  { %208 = dma.smem_to_hbm %s371_s11, 16, %s206_s9, [#allocation4]  }
 0x211   :  { %363 = dma.done.wait [#allocation4], 16  }
 0x212   :  { %364 = vsyncadd [#allocation4], 4294967280 }
 0x213   :  { %213 = sfence }
 0x214   :  { %214 = vsyncpa [#allocation3], 1 }
 0x215   :  { %215 = vsyncpa [#allocation6], 1 }
 0x216   :  { %216 = vsyncpa [#allocation9], 1 }
 0x217   :  { %217 = vsyncpa [#allocation4], 1 }

</bundles_post_ra>
